<compile_context>
chip_gen: v7x
topology: tpu7x:2x2x1
jax: 0.10.0
libtpu: 0.0.40
codegen_flags: <defaults>
</compile_context>

<pallas_src>
from functools import partial
import math

import jax
import jax.numpy as jnp
from jax.experimental import pallas as pl
from jax.experimental.pallas import tpu as pltpu

_LANE = 128


def _round_up(x, m):
    return ((x + m - 1) // m) * m


def _tapprox_kernel(t_ref, mtabT_ref, mW2T_ref, cols_ref, bias_ref, o_ref,
                    *, periodic_count, freq):
    # Transposed layout: batch on lanes, features on sublanes.
    t = t_ref[0]                                                     # (1, TB) f32

    # --- month index (clamped) + one-hot over sublanes ---
    # torch: m = (t % 12).int64().squeeze(1)
    m_idx = jnp.clip(jnp.mod(t, 12.0), 0.0, 11.0).astype(jnp.int32)  # (1, TB)
    row = jax.lax.broadcasted_iota(jnp.int32, (12, t.shape[1]), 0)
    onehot = (row == m_idx).astype(jnp.float32)                      # (12, TB)

    # --- m_encoder layer 1: embedding gather + Linear + bias, all folded into mtabT ---
    h = jnp.dot(mtabT_ref[...], onehot,
                preferred_element_type=jnp.float32)                  # (hid, TB)
    h = jnp.maximum(h, 0.0)

    cols = cols_ref[...]                                             # (hid, 5)
    mb2 = cols[:, 0:1]
    w3  = cols[:, 1:2]
    tw1 = cols[:, 2:3]
    tb1 = cols[:, 3:4]
    tw2 = cols[:, 4:5]

    # --- m_encoder layer 2 (only remaining real MXU matmul) ---
    h = jnp.dot(mW2T_ref[...], h,
                preferred_element_type=jnp.float32) + mb2            # (hid, TB)
    h = jnp.maximum(h, 0.0)

    # --- t_encoder first layer: K=1 outer product on the VPU ---
    ht = tw1 * t + tb1                                               # (hid, TB)
    sub = jax.lax.broadcasted_iota(jnp.int32, ht.shape, 0)
    ht_act = jnp.where(sub < periodic_count,
                       jnp.cos(freq * ht),                           # periodic units
                       jnp.maximum(ht, 0.0))                         # ReLU units

    # --- fused output projections + final add: VPU mul + one sublane reduce ---
    # xm = mW3^T @ h ; xt = tW2^T @ ht_act ; out = xt + xm + (mb3 + tb2)
    fused = h * w3 + ht_act * tw2                                    # (hid, TB)
    o_ref[0] = jnp.sum(fused, axis=0, keepdims=True) + bias_ref[0]   # (1, TB)


def t_approximator(t, params, *, cos_len, periodic_ratio, hid_dim, tile_b=1024):
    """t: (B, 1) float32. Returns (B, 1) float32."""
    B = t.shape[0]
    hid = hid_dim
    periodic_count = int(hid_dim * periodic_ratio)
    freq = 2.0 * math.pi / float(cos_len)

    # ---- wrapper-side constant folds (XLA computes these once) ----
    mtabT = (jnp.dot(params["emb"], params["mW1"]) + params["mb1"]).T      # (hid, 12)
    mW2T = params["mW2"].T                                                 # (hid, hid)
    cols = jnp.stack([params["mb2"][0],                                    # (hid, 5)
                      params["mW3"][:, 0],
                      params["tW1"][0],
                      params["tb1"][0],
                      params["tW2"][:, 0]], axis=1)
    final_bias = (params["mb3"] + params["tb2"]).reshape((1,))             # SMEM scalar

    # ---- batch tiling: lane-dense, 128-aligned tiles; pad B instead of TILE_B=B ----
    bytes_per_row = 6 * hid * 4                         # ~6 live (hid,·) f32 slabs
    vmem_cap_rows = max(_LANE, ((8 << 20) // bytes_per_row) // _LANE * _LANE)
    tile_cap = max(_LANE, min(tile_b, vmem_cap_rows))
    b_ceil = _round_up(max(B, 1), _LANE)
    if b_ceil <= _LANE:
        TILE_B = _LANE                                   # single small tile
    else:
        # aim for >= 2 grid steps (v7x megacore), bounded by the VMEM-safe cap
        TILE_B = min(tile_cap, _round_up(-(-b_ceil // 2), _LANE))
    B_pad = _round_up(B, TILE_B)
    num_tiles = B_pad // TILE_B

    t_tiles = jnp.pad(t.reshape(-1), (0, B_pad - B)).reshape(num_tiles, 1, TILE_B)

    in_specs = [
        pl.BlockSpec((1, 1, TILE_B), lambda i: (i, 0, 0)),   # t (lane-dense)
        pl.BlockSpec((hid, 12), lambda i: (0, 0)),           # (emb@mW1 + mb1)^T
        pl.BlockSpec((hid, hid), lambda i: (0, 0)),          # mW2^T
        pl.BlockSpec((hid, 5), lambda i: (0, 0)),            # stacked feature vectors
        pl.BlockSpec(memory_space=pltpu.MemorySpace.SMEM),   # mb3 + tb2 scalar
    ]
    out_specs = pl.BlockSpec((1, 1, TILE_B), lambda i: (i, 0, 0))

    out = pl.pallas_call(
        partial(_tapprox_kernel, periodic_count=periodic_count, freq=freq),
        out_shape=jax.ShapeDtypeStruct((num_tiles, 1, TILE_B), jnp.float32),
        grid=(num_tiles,),
        in_specs=in_specs,
        out_specs=out_specs,
        compiler_params=pltpu.CompilerParams(dimension_semantics=("parallel",)),
    )(t_tiles, mtabT, mW2T, cols, final_bias)

    return out.reshape(B_pad)[:B].reshape(B, 1)


def init_params(key, m_embed_dim, hid_dim):
    ks = jax.random.split(key, 11)
    s = 0.1
    return {
        "emb": jax.random.normal(ks[0], (12, m_embed_dim), jnp.float32) * s,
        # m_encoder: CustomMLP(m_embed_dim -> hid -> hid -> 1)
        "mW1": jax.random.normal(ks[1], (m_embed_dim, hid_dim), jnp.float32) * s,
        "mb1": jax.random.normal(ks[2], (1, hid_dim), jnp.float32) * s,
        "mW2": jax.random.normal(ks[3], (hid_dim, hid_dim), jnp.float32) * s,
        "mb2": jax.random.normal(ks[4], (1, hid_dim), jnp.float32) * s,
        "mW3": jax.random.normal(ks[5], (hid_dim, 1), jnp.float32) * s,
        "mb3": jax.random.normal(ks[6], (1, 1), jnp.float32) * s,
        # t_encoder: PartiallyPeriodicMLP(1 -> hid -> 1)
        "tW1": jax.random.normal(ks[7], (1, hid_dim), jnp.float32) * s,
        "tb1": jax.random.normal(ks[8], (1, hid_dim), jnp.float32) * s,
        "tW2": jax.random.normal(ks[9], (hid_dim, 1), jnp.float32) * s,
        "tb2": jax.random.normal(ks[10], (1, 1), jnp.float32) * s,
    }


def reference_forward(t, params, *, cos_len, periodic_ratio, hid_dim):
    """Pure-JAX reference mirroring the PyTorch forward."""
    periodic_count = int(hid_dim * periodic_ratio)
    freq = 2.0 * math.pi / float(cos_len)
    m = jnp.mod(t[:, 0], 12.0).astype(jnp.int32)
    m_embed = params["emb"][m]
    h = jax.nn.relu(m_embed @ params["mW1"] + params["mb1"])
    h = jax.nn.relu(h @ params["mW2"] + params["mb2"])
    xm = h @ params["mW3"] + params["mb3"]
    ht = t @ params["tW1"] + params["tb1"]
    per = jnp.cos(freq * ht[:, :periodic_count])
    non = jax.nn.relu(ht[:, periodic_count:])
    ht_act = jnp.concatenate([per, non], axis=1)
    xt = ht_act @ params["tW2"] + params["tb2"]
    return xt + xm


if __name__ == "__main__":
    B = 8
    m_embed_dim = 8
    hid_dim = 32
    cos_len = 16
    periodic_ratio = 0.2

    key = jax.random.PRNGKey(0)
    k_t, k_p = jax.random.split(key)
    # t: fractional time steps, shape (B, 1) like the PyTorch module expects
    t = jax.random.uniform(k_t, (B, 1), jnp.float32, minval=0.0, maxval=120.0)
    params = init_params(k_p, m_embed_dim, hid_dim)

    fwd = jax.jit(partial(t_approximator, cos_len=cos_len,
                          periodic_ratio=periodic_ratio, hid_dim=hid_dim))
    out = fwd(t, params)
    jax.block_until_ready(out)

    ref = reference_forward(t, params, cos_len=cos_len,
                            periodic_ratio=periodic_ratio, hid_dim=hid_dim)
    assert out.shape == (B, 1)
    assert jnp.allclose(out, ref, atol=1e-3, rtol=1e-3)

    print("KERNEL_OK")
</pallas_src>

<mosaic_0001>
module attributes {stable_mosaic.version = 11 : i64} {
  func.func @_tapprox_kernel(%arg0: i32, %arg1: memref<1x1x128xf32, #tpu.memory_space<vmem>>, %arg2: memref<32x12xf32, #tpu.memory_space<vmem>>, %arg3: memref<32x32xf32, #tpu.memory_space<vmem>>, %arg4: memref<32x5xf32, #tpu.memory_space<vmem>>, %arg5: memref<1xf32, #tpu.memory_space<smem>>, %arg6: memref<1x1x128xf32, #tpu.memory_space<vmem>>) attributes {dimension_semantics = [#tpu.dimension_semantics<parallel>], iteration_bounds = array<i64: 1>, scalar_prefetch = 0 : i64, scratch_operands = 0 : i64, tpu.core_type = #tpu.core_type<tc>, window_params = [{transform_indices = @transform_0, window_bounds = array<i64: 1, 1, 128>}, {pipeline_mode = #tpu.pipeline_mode<synchronous>, transform_indices = @transform_1, window_bounds = array<i64: 32, 12>}, {pipeline_mode = #tpu.pipeline_mode<synchronous>, transform_indices = @transform_2, window_bounds = array<i64: 32, 32>}, {pipeline_mode = #tpu.pipeline_mode<synchronous>, transform_indices = @transform_3, window_bounds = array<i64: 32, 5>}, {transform_indices = @transform_4, window_bounds = array<i64: 1>}, {transform_indices = @transform_5, window_bounds = array<i64: 1, 1, 128>}]} {
    %c0 = arith.constant 0 : index
    %c0_0 = arith.constant 0 : index
    %c0_1 = arith.constant 0 : index
    %0 = vector.load %arg1[%c0, %c0_0, %c0_1] : memref<1x1x128xf32, #tpu.memory_space<vmem>>, vector<1x1x128xf32>
    %1 = vector.shape_cast %0 : vector<1x1x128xf32> to vector<1x128xf32>
    %cst = arith.constant 1.200000e+01 : f32
    %2 = vector.broadcast %cst : f32 to vector<1x128xf32>
    %3 = arith.remf %1, %2 : vector<1x128xf32>
    %cst_2 = arith.constant 0.000000e+00 : f32
    %4 = vector.broadcast %cst_2 : f32 to vector<1x128xf32>
    %5 = arith.cmpf one, %3, %4 : vector<1x128xf32>
    %cst_3 = arith.constant 0.000000e+00 : f32
    %6 = vector.broadcast %cst_3 : f32 to vector<1x128xf32>
    %7 = arith.cmpf olt, %3, %6 : vector<1x128xf32>
    %cst_4 = arith.constant 0.000000e+00 : f32
    %8 = arith.cmpf olt, %cst, %cst_4 : f32
    %9 = vector.broadcast %8 : i1 to vector<1x128xi1>
    %10 = vector.broadcast %9 : vector<1x128xi1> to vector<1x128xi1>
    %11 = arith.xori %7, %10 : vector<1x128xi1>
    %12 = arith.andi %11, %5 : vector<1x128xi1>
    %13 = vector.broadcast %cst : f32 to vector<1x128xf32>
    %14 = arith.addf %3, %13 : vector<1x128xf32>
    %15 = arith.select %12, %14, %3 : vector<1x128xi1>, vector<1x128xf32>
    %cst_5 = arith.constant 0.000000e+00 : f32
    %cst_6 = arith.constant 1.100000e+01 : f32
    %16 = vector.broadcast %cst_5 : f32 to vector<1x128xf32>
    %17 = arith.maximumf %16, %15 : vector<1x128xf32>
    %18 = vector.broadcast %cst_6 : f32 to vector<1x128xf32>
    %19 = arith.minimumf %18, %17 : vector<1x128xf32>
    %20 = arith.fptosi %19 : vector<1x128xf32> to vector<1x128xi32>
    %21 = tpu.iota {dimensions = array<i32: 0>} : vector<12x128xi32>
    %22 = vector.broadcast %20 : vector<1x128xi32> to vector<12x128xi32>
    %23 = arith.cmpi eq, %21, %22 : vector<12x128xi32>
    %24 = arith.extui %23 : vector<12x128xi1> to vector<12x128xi32>
    %25 = arith.sitofp %24 : vector<12x128xi32> to vector<12x128xf32>
    %c0_7 = arith.constant 0 : index
    %c0_8 = arith.constant 0 : index
    %26 = vector.load %arg2[%c0_7, %c0_8] : memref<32x12xf32, #tpu.memory_space<vmem>>, vector<32x12xf32>
    %cst_9 = arith.constant dense<0.000000e+00> : vector<32x128xf32>
    %27 = tpu.matmul %26, %25, %cst_9 {dimension_numbers = #tpu.dot_dimension_numbers<[1], [0], [0], [1], [0, 0, 1, 1], [], []>} : vector<32x12xf32>, vector<12x128xf32>, vector<32x128xf32> -> vector<32x128xf32>
    %cst_10 = arith.constant 0.000000e+00 : f32
    %28 = vector.broadcast %cst_10 : f32 to vector<32x128xf32>
    %29 = arith.maximumf %27, %28 : vector<32x128xf32>
    %c0_11 = arith.constant 0 : index
    %c0_12 = arith.constant 0 : index
    %30 = vector.load %arg4[%c0_11, %c0_12] : memref<32x5xf32, #tpu.memory_space<vmem>>, vector<32x5xf32>
    %31 = vector.extract_strided_slice %30 {offsets = [0, 0], sizes = [32, 1], strides = [1, 1]} : vector<32x5xf32> to vector<32x1xf32>
    %32 = vector.extract_strided_slice %30 {offsets = [0, 1], sizes = [32, 1], strides = [1, 1]} : vector<32x5xf32> to vector<32x1xf32>
    %33 = vector.extract_strided_slice %30 {offsets = [0, 2], sizes = [32, 1], strides = [1, 1]} : vector<32x5xf32> to vector<32x1xf32>
    %34 = vector.extract_strided_slice %30 {offsets = [0, 3], sizes = [32, 1], strides = [1, 1]} : vector<32x5xf32> to vector<32x1xf32>
    %35 = vector.extract_strided_slice %30 {offsets = [0, 4], sizes = [32, 1], strides = [1, 1]} : vector<32x5xf32> to vector<32x1xf32>
    %c0_13 = arith.constant 0 : index
    %c0_14 = arith.constant 0 : index
    %36 = vector.load %arg3[%c0_13, %c0_14] : memref<32x32xf32, #tpu.memory_space<vmem>>, vector<32x32xf32>
    %cst_15 = arith.constant dense<0.000000e+00> : vector<32x128xf32>
    %37 = tpu.matmul %36, %29, %cst_15 {dimension_numbers = #tpu.dot_dimension_numbers<[1], [0], [0], [1], [0, 0, 1, 1], [], []>} : vector<32x32xf32>, vector<32x128xf32>, vector<32x128xf32> -> vector<32x128xf32>
    %38 = vector.broadcast %31 : vector<32x1xf32> to vector<32x128xf32>
    %39 = arith.addf %37, %38 : vector<32x128xf32>
    %cst_16 = arith.constant 0.000000e+00 : f32
    %40 = vector.broadcast %cst_16 : f32 to vector<32x128xf32>
    %41 = arith.maximumf %39, %40 : vector<32x128xf32>
    %42 = vector.broadcast %33 : vector<32x1xf32> to vector<32x128xf32>
    %43 = vector.broadcast %1 : vector<1x128xf32> to vector<32x128xf32>
    %44 = arith.mulf %42, %43 : vector<32x128xf32>
    %45 = vector.broadcast %34 : vector<32x1xf32> to vector<32x128xf32>
    %46 = arith.addf %44, %45 : vector<32x128xf32>
    %47 = tpu.iota {dimensions = array<i32: 0>} : vector<32x128xi32>
    %c6_i32 = arith.constant 6 : i32
    %48 = vector.broadcast %c6_i32 : i32 to vector<32x128xi32>
    %49 = arith.cmpi slt, %47, %48 : vector<32x128xi32>
    %cst_17 = arith.constant 0.392699093 : f32
    %50 = vector.broadcast %cst_17 : f32 to vector<32x128xf32>
    %51 = arith.mulf %50, %46 : vector<32x128xf32>
    %52 = math.cos %51 : vector<32x128xf32>
    %cst_18 = arith.constant 0.000000e+00 : f32
    %53 = vector.broadcast %cst_18 : f32 to vector<32x128xf32>
    %54 = arith.maximumf %46, %53 : vector<32x128xf32>
    %55 = arith.select %49, %52, %54 : vector<32x128xi1>, vector<32x128xf32>
    %56 = vector.broadcast %32 : vector<32x1xf32> to vector<32x128xf32>
    %57 = arith.mulf %41, %56 : vector<32x128xf32>
    %58 = vector.broadcast %35 : vector<32x1xf32> to vector<32x128xf32>
    %59 = arith.mulf %55, %58 : vector<32x128xf32>
    %60 = arith.addf %57, %59 : vector<32x128xf32>
    %cst_19 = arith.constant dense<0.000000e+00> : vector<128xf32>
    %61 = vector.multi_reduction <add>, %60, %cst_19 [0] : vector<32x128xf32> to vector<128xf32>
    %62 = vector.shape_cast %61 : vector<128xf32> to vector<1x128xf32>
    %c0_20 = arith.constant 0 : index
    %63 = memref.load %arg5[%c0_20] : memref<1xf32, #tpu.memory_space<smem>>
    %64 = vector.broadcast %63 : f32 to vector<1x128xf32>
    %65 = arith.addf %62, %64 : vector<1x128xf32>
    %c0_21 = arith.constant 0 : index
    %c0_22 = arith.constant 0 : index
    %c0_23 = arith.constant 0 : index
    %66 = vector.load %arg6[%c0_21, %c0_22, %c0_23] : memref<1x1x128xf32, #tpu.memory_space<vmem>>, vector<1x1x128xf32>
    %67 = vector.shape_cast %66 : vector<1x1x128xf32> to vector<1x128xf32>
    %68 = vector.shape_cast %65 : vector<1x128xf32> to vector<1x1x128xf32>
    tpu.vector_store %arg6[%c0_21, %c0_22, %c0_23], %68 {strides = array<i32>} : memref<1x1x128xf32, #tpu.memory_space<vmem>>, vector<1x1x128xf32>,
    return
  }
  func.func @transform_0(%arg0: i32) -> (i32, i32, i32) {
    %c0_i32 = arith.constant 0 : i32
    %c0_i32_0 = arith.constant 0 : i32
    %c0_i32_1 = arith.constant 0 : i32
    return %arg0, %c0_i32, %c0_i32_0 : i32, i32, i32
  }
  func.func @transform_1(%arg0: i32) -> (i32, i32) {
    %c0_i32 = arith.constant 0 : i32
    %c0_i32_0 = arith.constant 0 : i32
    %c0_i32_1 = arith.constant 0 : i32
    return %c0_i32, %c0_i32_0 : i32, i32
  }
  func.func @transform_2(%arg0: i32) -> (i32, i32) {
    %c0_i32 = arith.constant 0 : i32
    %c0_i32_0 = arith.constant 0 : i32
    %c0_i32_1 = arith.constant 0 : i32
    return %c0_i32, %c0_i32_0 : i32, i32
  }
  func.func @transform_3(%arg0: i32) -> (i32, i32) {
    %c0_i32 = arith.constant 0 : i32
    %c0_i32_0 = arith.constant 0 : i32
    %c0_i32_1 = arith.constant 0 : i32
    return %c0_i32, %c0_i32_0 : i32, i32
  }
  func.func @transform_4(%arg0: i32) -> i32 {
    %c0_i32 = arith.constant 0 : i32
    %c0_i32_0 = arith.constant 0 : i32
    return %c0_i32 : i32
  }
  func.func @transform_5(%arg0: i32) -> (i32, i32, i32) {
    %c0_i32 = arith.constant 0 : i32
    %c0_i32_0 = arith.constant 0 : i32
    %c0_i32_1 = arith.constant 0 : i32
    return %arg0, %c0_i32, %c0_i32_0 : i32, i32, i32
  }
}

</mosaic_0001>

<bundles_post_ra>
// kernel: t_approximator.1
= control target key start
LH: loop header
LB: loop body
LE: loop exit
PB: predicated region body
PF: predicated region fallthrough
CT: control target
= control target key end

     0   :  { %v41_v0 = vlaneseq  ;;  %vm58_vm0 = vcmask 97280   ;;  %v947_v5 = vmov 2   ;;  %v948_v13 = vmov 3   ;;  %s1094_s0 = inlined_call_operand.vmem [shape: f32[1,1,128], index: 0, kind: input, shape index: {}]   ;;  %s1095_s1 = inlined_call_operand.vmem [shape: f32[32,12], index: 1, kind: input, shape index: {}]   ;;  %s1096_s3 = inlined_call_operand.vmem [shape: f32[32,5], index: 3, kind: input, shape index: {}]   ;;  %s1097_s2 = inlined_call_operand.vmem [shape: f32[32,32], index: 2, kind: input, shape index: {}]   ;;  %s1098_s4 = inlined_call_operand.<no memory space> [shape: f32[1], index: 4, kind: input, shape index: {}]   ;;  %s1099_s5 = inlined_call_operand.vmem [shape: f32[1,1,128], index: 5, kind: output, shape index: {}]  }
   0x1   :  { %v21_v1 = vld [vmem:[%s1094_s0] sm:$0x1]  ;;  %930 = vset.pattern.permute.xlu0 %v947_v5  ;;  %932 = vset.pattern.permute.xlu1 %v947_v5  ;;  %v1007_v7 = vld [vmem:[%s1096_s3 + $0x8] sm:$0xff]  ;;  %v949_v14 = vmov 0   ;;  %vm71_vm5 = vcmask 1043456   ;;  %v950_v28 = vmov 0.0  }
   0x2   :  { %v54_v2 = vld [vmem:[%s1095_s1] sm:$0xff]  ;;  %v22_v3 = vand.u32 2147483647, %v21_v1  ;;  %v996_v4 = vshrl.u32 %v41_v0, 7  ;;  %299 = vperm.xlu1 %932, %v1007_v7   ;;  %v31_v16 = vand.u32 2147483648, %v21_v1  ;;  %v951_v30 = vmov 1.0  }
   0x3   :  { %877 = vmatprep.mubr.msk.f32.mxu0 %vm58_vm0, %v54_v2  ;;  %v1002_v6 = vld [vmem:[%s1096_s3] sm:$0xff]  ;;  %v55_v32 = vld [vmem:[%s1095_s1 + $0x8] sm:$0xff]  ;;  %v56_v33 = vld [vmem:[%s1095_s1 + $0x10] sm:$0xff]  ;;  %vm192_vm9 = vcmask 261120   ;;  %v952_v38 = vmov 1   ;;  %v953_v41 = vmov 4  }
   0x4   :  { %v24_v8 = vmul.f32 0.083333336, %v22_v3  ;;  %v46_v9 = vsub.s32 0, %v996_v4  ;;  %295 = vperm.xlu0 %930, %v1002_v6   ;;  %v43_v26 = vadd.s32 8, %v996_v4  ;;  %v57_v34 = vld [vmem:[%s1095_s1 + $0x18] sm:$0xff]  ;;  %v166_v35 = vld [vmem:[%s1096_s3 + $0x10] sm:$0xff] }
   0x5   :  { %v167_v36 = vld [vmem:[%s1096_s3 + $0x18] sm:$0xff]  ;;  %v168_v37 = vld [vmem:[%s1097_s2] sm:$0xff]  ;;  %v954_v55 = vmov 2102212464   ;;  %v955_v57 = vmov 920167782  }
   0x6   :  { %v25_v10 = vfloor.f32 %v24_v8  ;;  %v1012_v11 = vrot.slane %v21_v1, %v46_v9  ;;  %933 = vset.pattern.permute.xlu1 %v949_v14  ;;  %891 = vmatprep.mubr.msk.f32.mxu1 %vm192_vm9, %v168_v37  ;;  %v956_v60 = vmov 683565275   ;;  %v957_v62 = vmov 2475754826  }
   0x7   :  { %174 = vperm.xlu1 %933, %v1002_v6   ;;  %v958_v0 = vmov 2131351028  }
   0x8   :  { %v26_v12 = vmul.f32 12.0, %v25_v10  ;;  %931 = vset.pattern.permute.xlu0 %v948_v13 }
   0x9   :  { %321 = vperm.xlu0 %931, %v1002_v6  }
   0xa   :  { %v27_v15 = vsub.f32 %v22_v3, %v26_v12  ;;  %v959_v3 = vmov 1326507024  }
   0xb   :  { %179 = vperm.xlu1 %933, %v1007_v7  }
   0xc   :  { %vm28_vm1 = vcmp.eq.f32.partialorder %v27_v15, 12.0 }
   0xd   :  { %v29_v17 = vsel %vm28_vm1, 0.0, %v27_v15  ;;  %934 = vset.pattern.permute.xlu0 %v947_v5 }
   0xe   :  { %v30_v18 = vand.u32 2147483647, %v29_v17  ;;  %303 = vperm.xlu0 %934, %v166_v35  }
   0xf   :  { %935 = vset.pattern.permute.xlu1 %v948_v13 }
  0x10   :  { %v32_v19 = vor.u32 %v31_v16, %v30_v18  ;;  %325 = vperm.xlu1 %935, %v1007_v7  }
  0x12   :  { %vm33_vm2 = vcmp.ne.f32.partialorder %v32_v19, 0.0  ;;  %vm34_vm3 = vcmp.lt.f32.partialorder %v32_v19, 0.0  ;;  %v36_v20 = vadd.f32 12.0, %v32_v19  ;;  %307 = vperm.xlu0 %934, %v167_v36  }
  0x13   :  { %vm35_vm4 = vmand %vm34_vm3, %vm33_vm2 }
  0x14   :  { %v37_v21 = vsel %vm35_vm4, %v36_v20, %v32_v19  ;;  %936 = vset.pattern.permute.xlu1 %v949_v14 }
  0x15   :  { %v38_v22 = vmax.f32 %v37_v21, 0.0  ;;  %184 = vperm.xlu1 %936, %v166_v35  }
  0x16   :  { %938 = vset.pattern.permute.xlu0 %v949_v14 }
  0x17   :  { %v39_v23 = vmin.f32 %v38_v22, 11.0  ;;  %189 = vperm.xlu0 %938, %v167_v36  }
  0x19   :  { %v911_v24 = vtrunc.f32 %v39_v23  ;;  %937 = vset.pattern.permute.xlu1 %v948_v13 }
  0x1a   :  { %329 = vperm.xlu1 %937, %v166_v35  }
  0x1b   :  { %v912_v25 = vcvt.f32.s32 %v911_v24  ;;  %940 = vset.pattern.permute.xlu0 %v952_v38 }
  0x1c   :  { %775 = vperm.xlu0 %940, %v1007_v7  }
  0x1d   :  { %v47_v27 = vrot.slane %v912_v25, %v46_v9 }
  0x1e   :  { %333 = vperm.xlu1 %937, %v167_v36  }
  0x1f   :  { %vm48_vm6 = vcmp.eq.s32.totalorder %v996_v4, %v47_v27  ;;  %vm49_vm7 = vcmp.eq.s32.totalorder %v43_v26, %v47_v27 }
  0x20   :  { %v832_v29 = vsel %vm49_vm7, 1.0, %v950_v28  ;;  %vm898_vm8 = vmpackc.low %vm71_vm5, %vm48_vm6  ;;  %779 = vperm.xlu0 %940, %v166_v35   ;;  %vm342_vm7 = vcmp.lt.s32.totalorder %v996_v4, 6  ;;  %v169_v4 = vld [vmem:[%s1097_s2 + $0x8] sm:$0xff] }
  0x21   :  { %v897_v31 = vpack.c.bf16 %v832_v29, %v951_v30 }
  0x22   :  { %939 = vset.pattern.permute.xlu1 %v952_v38 }
  0x23   :  { %899 = vmatprep.subr.msk.bf16.mxu0 %vm898_vm8, %v897_v31  ;;  %771 = vperm.xlu1 %939, %v1002_v6  }
  0x24   :  { %902 = vmatpush3.bf16.msk.msra.mxu0 %vm898_vm8, %v897_v31  ;;  %783 = vperm.xlu0 %940, %v167_v36  }
  0x27   :  { %878 = vmatmul.mubr.msk.f32.vlgmr.msra.gmra.mrb[0].mxu0 %vm58_vm0, %v55_v32  ;;  %941 = vset.pattern.permute.xlu1 %v953_v41 }
  0x28   :  { %880 = vmatprep.mubr.msk.f32.mxu0 %vm58_vm0, %v56_v33  ;;  %791 = vperm.xlu1 %941, %v1002_v6  }
  0x29   :  { %942 = vset.pattern.permute.xlu0 %v953_v41 }
  0x2b   :  { %881 = vmatmul.mubr.msk.f32.gmra.mrb[2].mxu0 %vm58_vm0, %v57_v34 }
  0x2c   :  { %795 = vperm.xlu1 %941, %v1007_v7  }
  0x30   :  { %799 = vperm.xlu1 %941, %v166_v35  }
  0x34   :  { %803 = vperm.xlu1 %941, %v167_v36  }
  0x83   :  { %v296_v39 = vpop.permute.xlu0 %295 }
  0x84   :  { %v316_v40 = vmul.f32 %v1012_v11, %v296_v39 }
  0x88   :  { %v322_v42 = vpop.permute.xlu0 %321 }
  0x89   :  { %v1046_v43 = vadd.f32 %v322_v42, %v316_v40 }
  0x8b   :  { %v1049_v44 = vmul.f32 0.3926991, %v1046_v43 }
  0x8d   :  { %v353_v45 = vand.u32 2139095040, %v1049_v44  ;;  %v350_v48 = vand.u32 2147483647, %v1049_v44  ;;  %vm352_vm1 = vcmp.lt.s32.totalorder %v1049_v44, 0  ;;  %vm442_vm6 = vweird.f32 %v1049_v44 }
  0x8f   :  { %v354_v46 = vshrl.u32 %v353_v45, 23  ;;  %v357_v51 = vand.u32 8388607, %v350_v48  ;;  %vm351_vm2 = vcmp.le.f32.partialorder %v350_v48, 0.7853982 }
  0x91   :  { %v843_v47 = vadd.s32 4294967169, %v354_v46  ;;  %v358_v59 = vor.u32 8388608, %v357_v51 }
  0x93   :  { %v360_v49 = vadd.s32 1, %v843_v47  ;;  %v398_v16 = vshll.u32 %v358_v59, 8 }
  0x95   :  { %vm361_vm10 = vcmp.gt.s32.totalorder %v360_v49, 0 }
  0x96   :  { %v362_v50 = vsel %vm361_vm10, %v360_v49, 0 }
  0x97   :  { %v364_v52 = vand.u32 31, %v362_v50  ;;  %v363_v53 = vshrl.u32 %v362_v50, 5 }
  0x99   :  { %v365_v54 = vsub.s32 32, %v364_v52  ;;  %v376_v56 = vshll.u32 %v954_v55, %v364_v52  ;;  %v379_v58 = vshll.u32 %v955_v57, %v364_v52  ;;  %v367_v61 = vshll.u32 %v956_v60, %v364_v52 }
  0x9a   :  { %v370_v63 = vshll.u32 %v957_v62, %v364_v52  ;;  %v373_v1 = vshll.u32 %v958_v0, %v364_v52  ;;  %vm385_vm11 = vcmp.lt.s32.totalorder %v363_v53, 4  ;;  %vm382_vm12 = vcmp.lt.s32.totalorder %v363_v53, 1 }
  0x9b   :  { %v377_v2 = vshrl.u32 %v955_v57, %v365_v54  ;;  %v380_v5 = vshrl.u32 %v959_v3, %v365_v54  ;;  %v366_v6 = vshrl.u32 %v956_v60, %v365_v54  ;;  %v368_v7 = vshrl.u32 %v957_v62, %v365_v54 }
  0x9c   :  { %v371_v8 = vshrl.u32 %v958_v0, %v365_v54  ;;  %v374_v9 = vshrl.u32 %v954_v55, %v365_v54  ;;  %vm384_vm13 = vcmp.lt.s32.totalorder %v363_v53, 3  ;;  %vm383_vm14 = vcmp.lt.s32.totalorder %v363_v53, 2 }
  0x9d   :  { %v378_v10 = vor.u32 %v377_v2, %v376_v56  ;;  %v381_v12 = vor.u32 %v380_v5, %v379_v58  ;;  %v369_v13 = vor.u32 %v368_v7, %v367_v61 }
  0x9e   :  { %v372_v14 = vor.u32 %v371_v8, %v370_v63  ;;  %v375_v15 = vor.u32 %v374_v9, %v373_v1  ;;  %v762_v9 = vmax.f32 %v1046_v43, 0.0 }
  0x9f   :  { %v391_v17 = vsel %vm385_vm11, %v378_v10, 920167782  ;;  %v395_v18 = vsel %vm385_vm11, %v381_v12, 1326507024  ;;  %v386_v19 = vsel %vm382_vm12, %v366_v6, %v369_v13 }
  0xa0   :  { %v387_v20 = vsel %vm385_vm11, %v375_v15, 2102212464  ;;  %v390_v21 = vsel %vm382_vm12, %v369_v13, %v372_v14  ;;  %v392_v22 = vsel %vm384_vm13, %v375_v15, %v391_v17  ;;  %v394_v23 = vsel %vm382_vm12, %v372_v14, %v375_v15 }
  0xa1   :  { %v388_v24 = vsel %vm384_vm13, %v372_v14, %v387_v20  ;;  %v393_v25 = vsel %vm383_vm14, %v390_v21, %v392_v22  ;;  %v396_v26 = vsel %vm384_vm13, %v378_v10, %v395_v18 }
  0xa2   :  { %v389_v27 = vsel %vm383_vm14, %v386_v19, %v388_v24  ;;  %v397_v28 = vsel %vm383_vm14, %v394_v23, %v396_v26  ;;  %v1056_v29 = vmul.u32.u64.low %v398_v16, %v393_v25  ;;  %v1057_v30 = vmul.u32.u64.high %v398_v16, %v393_v25, %v1056_v29  ;;  %v171_v24 = vld [vmem:[%s1097_s2 + $0x18] sm:$0xff]  ;;  %v300_v25 = vpop.permute.xlu1 %299 }
  0xa3   :  { %v1059_v31 = vmul.u32.u64.low %v398_v16, %v397_v28  ;;  %v1060_v32 = vmul.u32.u64.high %v398_v16, %v397_v28, %v1059_v31  ;;  %v405_v33 = vmul.u32 %v398_v16, %v389_v27 }
  0xa4   :  { %v408_v34 = vadd.s32 1, %v1057_v30  ;;  %v304_v31 = vpop.permute.xlu0 %303 }
  0xa5   :  { %vm407_vm15 = vc.u32 %v1060_v32, %v1056_v29  ;;  %v406_v47 = vadd.s32 %v1056_v29, %v1060_v32 }
  0xa6   :  { %v409_v35 = vsel %vm407_vm15, %v408_v34, %v1057_v30  ;;  %v175_v26 = vpop.permute.xlu1 %174 }
  0xa7   :  { %v410_v36 = vadd.s32 %v409_v35, %v405_v33 }
  0xa8   :  { %v308_v33 = vpop.permute.xlu0 %307 }
  0xa9   :  { %v411_v37 = vadd.s32 536870912, %v410_v36 }
  0xaa   :  { %v180_v27 = vpop.permute.xlu1 %179 }
  0xab   :  { %v412_v38 = vshrl.u32 %v411_v37, 30 }
  0xac   :  { %v190_v35 = vpop.permute.xlu0 %189 }
  0xad   :  { %v413_v39 = vshll.u32 %v412_v38, 30  ;;  %v436_v62 = vsub.s32 4, %v412_v38 }
  0xae   :  { %v326_v28 = vpop.permute.xlu1 %325 }
  0xaf   :  { %v414_v40 = vsub.s32 %v410_v36, %v413_v39  ;;  %v437_v1 = vsel %vm352_vm1, %v436_v62, %v412_v38  ;;  %v317_v36 = vmul.f32 %v1012_v11, %v300_v25 }
  0xb0   :  { %v439_v2 = vsel %vm351_vm2, 0, %v437_v1  ;;  %v776_v39 = vpop.permute.xlu0 %775 }
  0xb1   :  { %v416_v41 = vsub.s32 0, %v414_v40  ;;  %v443_v3 = vand.u32 3, %v439_v2  ;;  %v337_v38 = vadd.f32 %v326_v28, %v317_v36 }
  0xb2   :  { %v185_v29 = vpop.permute.xlu1 %184 }
  0xb3   :  { %v844_v42 = vmin.u32 %v416_v41, %v414_v40  ;;  %vm448_vm3 = vcmp.eq.s32.totalorder %v443_v3, 2  ;;  %vm445_vm4 = vcmp.eq.s32.totalorder %v443_v3, 0  ;;  %vm444_vm5 = vcmp.lt.s32.totalorder %v443_v3, 2 }
  0xb5   :  { %v418_v45 = vclz %v844_v42  ;;  %v319_v42 = vmul.f32 %v1012_v11, %v308_v33 }
  0xb6   :  { %v330_v30 = vpop.permute.xlu1 %329 }
  0xb7   :  { %v845_v46 = vadd.s32 4294967294, %v418_v45 }
  0xb9   :  { %vm846_vm0 = vcmp.lt.s32.totalorder %v845_v46, 0 }
  0xba   :  { %v421_v49 = vsel %vm846_vm0, 0, %v845_v46  ;;  %v334_v32 = vpop.permute.xlu1 %333  ;;  %v763_v46 = vmax.f32 %v337_v38, 0.0 }
  0xbb   :  { %v422_v50 = vsub.s32 32, %v421_v49  ;;  %v423_v51 = vshll.u32 %v414_v40, %v421_v49  ;;  %v426_v52 = vsub.s32 4294967266, %v421_v49  ;;  %v318_v40 = vmul.f32 %v1012_v11, %v304_v31 }
  0xbd   :  { %v424_v53 = vshrl.u32 %v406_v47, %v422_v50  ;;  %v427_v54 = vadd.s32 127, %v426_v52  ;;  %v338_v50 = vadd.f32 %v330_v30, %v318_v40 }
  0xbe   :  { %v772_v34 = vpop.permute.xlu1 %771 }
  0xbf   :  { %v425_v55 = vor.u32 %v424_v53, %v423_v51  ;;  %v428_v56 = vshll.u32 %v427_v54, 23  ;;  %v780_v53 = vpop.permute.xlu0 %779 }
  0xc1   :  { %v429_v57 = vor.u32 4788187, %v428_v56  ;;  %v432_v58 = vcvt.s32.f32 %v425_v55  ;;  %v339_v55 = vadd.f32 %v334_v32, %v319_v42 }
  0xc2   :  { %v792_v37 = vpop.permute.xlu1 %791 }
  0xc3   :  { %v430_v59 = vand.u32 2147483647, %v429_v57  ;;  %v765_v3 = vmax.f32 %v339_v55, 0.0 }
  0xc5   :  { %v433_v60 = vmul.f32 %v432_v58, %v430_v59 }
  0xc6   :  { %v796_v41 = vpop.permute.xlu1 %795 }
  0xc7   :  { %v434_v61 = vxor.u32 2147483648, %v433_v60  ;;  %v807_v58 = vmul.f32 %v796_v41, %v763_v46 }
  0xc9   :  { %v435_v63 = vsel %vm352_vm1, %v434_v61, %v433_v60 }
  0xca   :  { %v438_v0 = vsel %vm351_vm2, %v1049_v44, %v435_v63  ;;  %v170_v44 = vld [vmem:[%s1097_s2 + $0x10] sm:$0xff]  ;;  %v800_v52 = vpop.permute.xlu1 %799  ;;  %v764_v63 = vmax.f32 %v338_v50, 0.0 }
  0xcb   :  { %943 = vcosq.f32 %v438_v0 }
  0xcc   :  { %945 = vsinq.f32 %v438_v0 }
  0xd5   :  { %v944_v5 = vpop.eup %943 }
  0xd6   :  { %v946_v6 = vpop.eup %945  ;;  %v449_v7 = vxor.u32 2147483648, %v944_v5 }
  0xd7   :  { %v446_v8 = vxor.u32 2147483648, %v946_v6 }
  0xd8   :  { %v450_v48 = vsel %vm448_vm3, %v449_v7, %v946_v6  ;;  %v804_v7 = vpop.permute.xlu1 %803 }
  0xd9   :  { %v447_v10 = vsel %vm445_vm4, %v944_v5, %v446_v8  ;;  %v784_v8 = vpop.permute.xlu0 %783 }
  0xda   :  { %v451_v12 = vsel %vm444_vm5, %v447_v10, %v450_v48 }
  0xdb   :  { %v452_v13 = vsel %vm442_vm6, nan, %v451_v12 }
  0xdc   :  { %v766_v14 = vsel %vm342_vm7, %v452_v13, %v762_v9  ;;  %v808_v9 = vmul.f32 %v800_v52, %v764_v63  ;;  %v809_v13 = vmul.f32 %v804_v7, %v765_v3 }
  0xdd   :  { %v806_v62 = vmul.f32 %v792_v37, %v766_v14 }
  0xfa   :  { %v879_v15 = vpop.f32.mrb[0].mxu0 }
  0xfb   :  { %v161_v16 = vmax.f32 %v879_v15, 0.0  ;;  %v141_v17 = vpop.f32.mrb[1].mxu0 }
  0xfc   :  { %v160_v18 = vmax.f32 %v141_v17, 0.0 }
  0xfe   :  { %v882_v19 = vpop.f32.mrb[2].mxu0  ;;  %v903_v20 = vpack.c.bf16 %v161_v16, %v160_v18 }
  0xff   :  { %v163_v21 = vmax.f32 %v882_v19, 0.0  ;;  %v151_v22 = vpop.f32.mrb[3].mxu0 }
 0x100   :  { %v162_v23 = vmax.f32 %v151_v22, 0.0  ;;  %904 = vmatprep.subr.bf16.mxu1 %v903_v20 }
 0x101   :  { %906 = vmatpush3.bf16.msra.mxu1 %v903_v20 }
 0x102   :  { %v907_v43 = vpack.c.bf16 %v163_v21, %v162_v23  ;;  %v824_v23 = vstv %s1098_s4 }
 0x104   :  { %908 = vmatprep.subr.bf16.mxu1 %v907_v43 }
 0x105   :  { %910 = vmatpush3.bf16.msra.mxu1 %v907_v43 }
 0x108   :  { %892 = vmatmul.mubr.msk.f32.vlgmr.msra.gmra.mrb[0].mxu1 %vm192_vm9, %v169_v4 }
 0x109   :  { %894 = vmatprep.mubr.msk.f32.mxu1 %vm192_vm9, %v170_v44 }
 0x10c   :  { %895 = vmatmul.mubr.msk.f32.gmra.mrb[2].mxu1 %vm192_vm9, %v171_v24 }
 0x1db   :  { %v893_v45 = vpop.f32.mrb[0].mxu1 }
 0x1dc   :  { %v277_v47 = vadd.f32 %v893_v45, %v180_v27  ;;  %v271_v49 = vpop.f32.mrb[1].mxu1 }
 0x1dd   :  { %v272_v51 = vadd.f32 %v271_v49, %v175_v26 }
 0x1de   :  { %v291_v54 = vmax.f32 %v277_v47, 0.0 }
 0x1df   :  { %v290_v56 = vmax.f32 %v272_v51, 0.0  ;;  %v896_v57 = vpop.f32.mrb[2].mxu1 }
 0x1e0   :  { %v787_v59 = vmul.f32 %v776_v39, %v291_v54  ;;  %v287_v60 = vadd.f32 %v896_v57, %v190_v35  ;;  %v281_v61 = vpop.f32.mrb[3].mxu1 }
 0x1e1   :  { %v786_v0 = vmul.f32 %v772_v34, %v290_v56  ;;  %v282_v11 = vadd.f32 %v281_v61, %v185_v29 }
 0x1e2   :  { %v811_v1 = vadd.f32 %v807_v58, %v787_v59  ;;  %v293_v2 = vmax.f32 %v287_v60, 0.0 }
 0x1e3   :  { %v810_v5 = vadd.f32 %v806_v62, %v786_v0  ;;  %v292_v6 = vmax.f32 %v282_v11, 0.0 }
 0x1e4   :  { %v789_v10 = vmul.f32 %v784_v8, %v293_v2 }
 0x1e5   :  { %v814_v48 = vadd.f32 %v811_v1, %v810_v5  ;;  %v788_v12 = vmul.f32 %v780_v53, %v292_v6 }
 0x1e6   :  { %v813_v16 = vadd.f32 %v809_v13, %v789_v10 }
 0x1e7   :  { %v812_v15 = vadd.f32 %v808_v9, %v788_v12 }
 0x1e9   :  { %v815_v17 = vadd.f32 %v814_v48, %v812_v15 }
 0x1eb   :  { %v816_v18 = vadd.f32 %v815_v17, %v813_v16 }
 0x1ed   :  { %v817_v14 = vrot.slane %v816_v18, 4 }
 0x1ef   :  { %v818_v19 = vadd.f32 %v817_v14, %v816_v18 }
 0x1f1   :  { %v819_v20 = vrot.slane %v818_v19, 2 }
 0x1f3   :  { %v820_v21 = vadd.f32 %v819_v20, %v818_v19 }
 0x1f5   :  { %v821_v22 = vrot.slane %v820_v21, 1 }
 0x1f7   :  { %v822_v43 = vadd.f32 %v821_v22, %v820_v21 }
 0x1f9   :  { %v825_v4 = vadd.f32 %v824_v23, %v822_v43 }
 0x1fb   :  { %826 = vst [vmem:[%s1099_s5] sm:$0x1] %v825_v4 }

</bundles_post_ra>
